<compile_context>
chip_gen: v7x
topology: tpu7x:2x2x1
jax: 0.10.0
libtpu: 0.0.40
codegen_flags: <defaults>
</compile_context>

<pallas_src>
import jax
import jax.numpy as jnp
from jax.experimental import pallas as pl
from jax.experimental.pallas import tpu as pltpu


def _round_up(x, m):
    return (x + m - 1) // m * m


def _choose_time_pack(c_out):
    """Pick P so the output row is exactly lane dense (P*C_out multiple of 128).

    Prefer 256 lanes (fills the 256-wide MXU N dim on v6e/v7x); fall back to
    128 lanes; P=1 (with column padding) if C_out divides neither.
    """
    for lanes in (256, 128):
        if lanes % c_out == 0:
            return lanes // c_out
    return 1


def _make_conv_kernel(*, K, P, T, padding, tile_rows, T_scratch, C_in,
                      compute_dtype):
    tile_t = tile_rows * P                 # output timesteps per grid step
    tail = T_scratch - (padding + T)       # zero rows past the padded input

    def kernel(x_ref, w_ref, o_ref, xpad_ref):
        # x_ref:    (1, T, C_in)        unpadded input for batch b; index_map is
        #                               constant over the time-tile axis -> the
        #                               block stays resident (one DMA per batch).
        # w_ref:    ((K+P-1)*C_in, N)   block-Toeplitz im2col weight, N = P*C_out.
        # o_ref:    (1, tile_rows, N)   P packed timesteps per row (lane-dense).
        # xpad_ref: (T_scratch, C_in)   VMEM scratch with the zero-padded input,
        #                               built once per batch (no HBM pad copy).
        t = pl.program_id(1)

        @pl.when(t == 0)
        def _():
            # Zero only the pad rows; the body rows are fully overwritten.
            if padding > 0:
                xpad_ref[pl.ds(0, padding), :] = jnp.zeros(
                    (padding, C_in), compute_dtype)
            if tail > 0:
                xpad_ref[pl.ds(padding + T, tail), :] = jnp.zeros(
                    (tail, C_in), compute_dtype)
            xpad_ref[pl.ds(padding, T), :] = x_ref[0]

        r0 = pl.multiple_of(t * tile_t, tile_t)

        # Block-Toeplitz im2col: row r of xc concatenates the K+P-1 taps
        # x_pad[r*P + j], j = 0..K+P-2, needed to emit output timesteps
        # [r*P, (r+1)*P).  One deep-contraction MXU matmul then produces P
        # timesteps per row -> the store is exactly lane-dense.
        def tap(j):
            if P > 1:
                return xpad_ref[pl.ds(r0 + j, tile_rows, stride=P), :]
            return xpad_ref[pl.ds(r0 + j, tile_rows), :]

        xc = jnp.concatenate([tap(j) for j in range(K + P - 1)], axis=-1)
        acc = jnp.dot(xc, w_ref[...], preferred_element_type=jnp.float32)
        o_ref[0] = acc.astype(o_ref.dtype)

    return kernel


def generator_forward(dense_x, tokens, dense_padding_mask, conv_weight,
                      *, kernel_size=4, stride=1, dilation=1, padding=None,
                      max_tile_t=512, time_pack=None,
                      compute_dtype=None, out_dtype=None):
    """Generator.forward under the default config (float input path).

    conv_weight:   PyTorch Conv1d layout (C_out, C_in, K), bias=False.
    compute_dtype: MXU operand dtype (e.g. jnp.bfloat16 on v6e/v7x for the
      full-rate MXU path and half the input HBM/VMEM); accumulation is f32.
    out_dtype:     dtype of the emitted activations (bf16 halves output writes).
    time_pack:     override for P, the number of timesteps packed per output row.
    """
    # TODO(synk): stride>1 / dilation>1 / avg_pool / batch_norm / residual /
    # dropout / 'int' input path are disabled in the default Wav2vecU_WordConfig
    # and not implemented.
    assert stride == 1 and dilation == 1
    if padding is None:
        padding = kernel_size // 2

    B, T, C_in = dense_x.shape
    C_out, C_in_w, K = conv_weight.shape
    assert C_in_w == C_in and K == kernel_size
    T_out = T + 2 * padding - K + 1

    if compute_dtype is None:
        compute_dtype = dense_x.dtype
    if out_dtype is None:
        out_dtype = dense_x.dtype

    # ---- multi-timestep (block-Toeplitz) packing -----------------------------
    P = _choose_time_pack(C_out) if time_pack is None else int(time_pack)
    N_lanes = _round_up(max(P * C_out, 128), 128)   # == P*C_out unless fallback
    R_out = -(-T_out // P)                          # output rows (P steps/row)

    # Time tiling: tile_rows output rows (= tile_rows*P timesteps) per step.
    tile_rows = _round_up(max(max_tile_t // P, 8), 8)
    tile_rows = min(tile_rows, _round_up(R_out, 8))
    n_t = -(-R_out // tile_rows)
    # Scratch covers every padded-time row any tile can touch (no OOB reads).
    T_scratch = n_t * tile_rows * P + K - 1

    # ---- block-Toeplitz im2col weight ----------------------------------------
    # w_big[j*C_in + ci, p*C_out + co] = W[co, ci, j - p] for 0 <= j - p < K.
    w_tap = jnp.transpose(conv_weight, (2, 1, 0)).astype(compute_dtype)  # (K,Cin,Cout)
    w_big = jnp.zeros((K + P - 1, C_in, P, C_out), compute_dtype)
    for p in range(P):
        w_big = w_big.at[p:p + K, :, p, :].set(w_tap)
    w_big = w_big.reshape((K + P - 1) * C_in, P * C_out)
    if N_lanes != P * C_out:
        w_big = jnp.pad(w_big, ((0, 0), (0, N_lanes - P * C_out)))

    # Cast the input once in the wrapper (halves HBM read / resident block /
    # scratch when compute_dtype is bf16; removes the per-tile VPU cast).
    x_c = dense_x.astype(compute_dtype)

    # Explicit VMEM budget (v7x: 64 MiB physical, 32 MiB default scoped limit).
    cb = jnp.dtype(compute_dtype).itemsize
    ob = jnp.dtype(out_dtype).itemsize
    vmem_est = (2 * T * C_in * cb                   # input block, double-buffered
                + T_scratch * C_in * cb             # padded-input scratch
                + 2 * int(w_big.size) * cb          # weight, double-buffered
                + 2 * tile_rows * N_lanes * ob)     # output block, double-buffered
    vmem_limit = int(min(max(2 * vmem_est + (8 << 20), 32 << 20), 128 << 20))

    kernel = _make_conv_kernel(K=K, P=P, T=T, padding=padding,
                               tile_rows=tile_rows, T_scratch=T_scratch,
                               C_in=C_in, compute_dtype=compute_dtype)

    out_p = pl.pallas_call(
        kernel,
        out_shape=jax.ShapeDtypeStruct((B, R_out, N_lanes), out_dtype),
        grid=(B, n_t),
        in_specs=[
            pl.BlockSpec((1, T, C_in), lambda b, t: (b, 0, 0)),
            pl.BlockSpec(((K + P - 1) * C_in, N_lanes), lambda b, t: (0, 0)),
        ],
        out_specs=pl.BlockSpec((1, tile_rows, N_lanes), lambda b, t: (b, t, 0)),
        scratch_shapes=[pltpu.VMEM((T_scratch, C_in), compute_dtype)],
        compiler_params=pltpu.CompilerParams(
            dimension_semantics=("parallel", "arbitrary"),
            vmem_limit_bytes=vmem_limit),
    )(x_c, w_big)

    if N_lanes == P * C_out:
        # Row-major contiguous reshape (free) back to (B, T_out, C_out).
        dense_out = out_p.reshape(B, R_out * P, C_out)
        if R_out * P != T_out:
            dense_out = dense_out[:, :T_out, :]
    else:
        # P == 1 fallback: lane-padded columns, slice them off.
        dense_out = out_p[:, :, :C_out]

    # padding-mask length fix-up (module prepends False columns on the left
    # when the conv output is longer than the mask; trims from the right
    # otherwise) — matches Generator.forward's new_padding[:, diff:] = mask.
    new_mask = dense_padding_mask
    if new_mask.shape[1] != T_out:
        diff = T_out - new_mask.shape[1]
        if diff > 0:
            new_mask = jnp.concatenate(
                [jnp.zeros((B, diff), dtype=new_mask.dtype), new_mask], axis=1)
        else:
            new_mask = new_mask[:, :diff]

    # token_x: one-hot scatter of token ids into output_dim.  Plain
    # jax.nn.one_hot — a dedicated pallas_call would be launch-overhead bound.
    token_x = None
    if tokens is not None:
        token_x = jax.nn.one_hot(tokens, C_out, dtype=dense_out.dtype)

    return {"dense_x": dense_out,
            "token_x": token_x,
            "dense_padding_mask": new_mask}


if __name__ == "__main__":
    key = jax.random.PRNGKey(0)
    # Default config shapes: input_dim=128, output_dim=target_dim=64.
    B, T, C_in, C_out, S = 2, 63, 128, 64, 8
    K, PAD = 4, 2            # generator_kernel=4, padding = K // 2

    k1, k2, k3 = jax.random.split(key, 3)
    dense_x = jax.random.normal(k1, (B, T, C_in), jnp.float32)
    tokens = jax.random.randint(k2, (B, S), 0, C_out)
    dense_padding_mask = jnp.zeros((B, T), dtype=jnp.bool_).at[:, T - 2:].set(True)

    # deterministic Conv1d weight, PyTorch layout (C_out, C_in, K), bias=False
    w_torch = jax.random.normal(k3, (C_out, C_in, K), jnp.float32) / ((C_in * K) ** 0.5)

    # f32 path, small time tiles so the multi-tile (t > 0) path is exercised.
    result = generator_forward(dense_x, tokens, dense_padding_mask, w_torch,
                               kernel_size=K, padding=PAD, max_tile_t=32)
    jax.block_until_ready(result)

    # reference check (plain JAX)
    T_out = T + 2 * PAD - K + 1
    x_pad = jnp.pad(dense_x, ((0, 0), (PAD, PAD), (0, 0)))
    ref = jnp.zeros((B, T_out, C_out), jnp.float32)
    for k in range(K):
        ref = ref + x_pad[:, k:k + T_out, :] @ w_torch[:, :, k].T

    assert result["dense_x"].shape == (B, T_out, C_out)
    assert jnp.allclose(result["dense_x"], ref, atol=2e-4, rtol=2e-4)
    assert jnp.allclose(result["token_x"],
                        jax.nn.one_hot(tokens, C_out, dtype=jnp.float32))
    assert result["dense_padding_mask"].shape == (B, T_out)
    assert bool(jnp.all(result["dense_padding_mask"][:, 0] == False))   # prepended col
    assert bool(jnp.all(result["dense_padding_mask"][:, 1:] == dense_padding_mask))

    # bf16 MXU-operand path (input / scratch / weight in bf16, f32 accumulation),
    # default (larger) time tile.
    result_bf16 = generator_forward(dense_x, tokens, dense_padding_mask, w_torch,
                                    kernel_size=K, padding=PAD,
                                    compute_dtype=jnp.bfloat16)
    jax.block_until_ready(result_bf16)
    assert jnp.allclose(result_bf16["dense_x"], ref, atol=5e-2, rtol=5e-2)

    print("KERNEL_OK")
</pallas_src>

<mosaic_0001>
module attributes {stable_mosaic.version = 11 : i64} {
  func.func @kernel(%arg0: i32, %arg1: i32, %arg2: memref<1x63x128xf32, #tpu.memory_space<vmem>>, %arg3: memref<896x256xf32, #tpu.memory_space<vmem>>, %arg4: memref<1x8x256xf32, #tpu.memory_space<vmem>>, %arg5: memref<67x128xf32, #tpu.memory_space<vmem>>) attributes {dimension_semantics = [#tpu.dimension_semantics<parallel>, #tpu.dimension_semantics<arbitrary>], iteration_bounds = array<i64: 2, 2>, scalar_prefetch = 0 : i64, scratch_operands = 1 : i64, tpu.core_type = #tpu.core_type<tc>, window_params = [{transform_indices = @transform_0, window_bounds = array<i64: 1, 63, 128>}, {pipeline_mode = #tpu.pipeline_mode<synchronous>, transform_indices = @transform_1, window_bounds = array<i64: 896, 256>}, {transform_indices = @transform_2, window_bounds = array<i64: 1, 8, 256>}]} {
    %c0_i32 = arith.constant 0 : i32
    %0 = arith.cmpi eq, %arg1, %c0_i32 : i32
    %1 = arith.extui %0 : i1 to i32
    %c0_i32_0 = arith.constant 0 : i32
    %2 = arith.cmpi ne, %1, %c0_i32_0 : i32
    scf.if %2 {
      %cst_13 = arith.constant 0.000000e+00 : f32
      %32 = vector.broadcast %cst_13 : f32 to vector<2x128xf32>
      %c0_14 = arith.constant 0 : index
      %c0_15 = arith.constant 0 : index
      %33 = vector.load %arg5[%c0_14, %c0_15] : memref<67x128xf32, #tpu.memory_space<vmem>>, vector<2x128xf32>
      tpu.vector_store %arg5[%c0_14, %c0_15], %32 {strides = array<i32>} : memref<67x128xf32, #tpu.memory_space<vmem>>, vector<2x128xf32>,
      %cst_16 = arith.constant 0.000000e+00 : f32
      %34 = vector.broadcast %cst_16 : f32 to vector<2x128xf32>
      %c65 = arith.constant 65 : index
      %c0_17 = arith.constant 0 : index
      %35 = vector.load %arg5[%c65, %c0_17] : memref<67x128xf32, #tpu.memory_space<vmem>>, vector<2x128xf32>
      tpu.vector_store %arg5[%c65, %c0_17], %34 {strides = array<i32>} : memref<67x128xf32, #tpu.memory_space<vmem>>, vector<2x128xf32>,
      %c0_18 = arith.constant 0 : index
      %c0_19 = arith.constant 0 : index
      %c0_20 = arith.constant 0 : index
      %36 = vector.load %arg2[%c0_18, %c0_19, %c0_20] : memref<1x63x128xf32, #tpu.memory_space<vmem>>, vector<1x63x128xf32>
      %37 = vector.shape_cast %36 : vector<1x63x128xf32> to vector<63x128xf32>
      %c2 = arith.constant 2 : index
      %c0_21 = arith.constant 0 : index
      %38 = vector.load %arg5[%c2, %c0_21] : memref<67x128xf32, #tpu.memory_space<vmem>>, vector<63x128xf32>
      tpu.vector_store %arg5[%c2, %c0_21], %37 {strides = array<i32>} : memref<67x128xf32, #tpu.memory_space<vmem>>, vector<63x128xf32>,
    } else {
    }
    %c32_i32 = arith.constant 32 : i32
    %3 = arith.muli %arg1, %c32_i32 : i32
    %4 = tpu.assume_multiple %3, 32 : i32
    %c0_i32_1 = arith.constant 0 : i32
    %5 = arith.addi %4, %c0_i32_1 : i32
    %6 = arith.index_cast %5 : i32 to index
    %c0 = arith.constant 0 : index
    %7 = tpu.strided_load %arg5[%6, %c0] {strides = array<i32: 4, 1>} : memref<67x128xf32, #tpu.memory_space<vmem>>, vector<8x128xf32>
    %c1_i32 = arith.constant 1 : i32
    %8 = arith.addi %4, %c1_i32 : i32
    %9 = arith.index_cast %8 : i32 to index
    %c0_2 = arith.constant 0 : index
    %10 = tpu.strided_load %arg5[%9, %c0_2] {strides = array<i32: 4, 1>} : memref<67x128xf32, #tpu.memory_space<vmem>>, vector<8x128xf32>
    %c2_i32 = arith.constant 2 : i32
    %11 = arith.addi %4, %c2_i32 : i32
    %12 = arith.index_cast %11 : i32 to index
    %c0_3 = arith.constant 0 : index
    %13 = tpu.strided_load %arg5[%12, %c0_3] {strides = array<i32: 4, 1>} : memref<67x128xf32, #tpu.memory_space<vmem>>, vector<8x128xf32>
    %c3_i32 = arith.constant 3 : i32
    %14 = arith.addi %4, %c3_i32 : i32
    %15 = arith.index_cast %14 : i32 to index
    %c0_4 = arith.constant 0 : index
    %16 = tpu.strided_load %arg5[%15, %c0_4] {strides = array<i32: 4, 1>} : memref<67x128xf32, #tpu.memory_space<vmem>>, vector<8x128xf32>
    %c4_i32 = arith.constant 4 : i32
    %17 = arith.addi %4, %c4_i32 : i32
    %18 = arith.index_cast %17 : i32 to index
    %c0_5 = arith.constant 0 : index
    %19 = tpu.strided_load %arg5[%18, %c0_5] {strides = array<i32: 4, 1>} : memref<67x128xf32, #tpu.memory_space<vmem>>, vector<8x128xf32>
    %c5_i32 = arith.constant 5 : i32
    %20 = arith.addi %4, %c5_i32 : i32
    %21 = arith.index_cast %20 : i32 to index
    %c0_6 = arith.constant 0 : index
    %22 = tpu.strided_load %arg5[%21, %c0_6] {strides = array<i32: 4, 1>} : memref<67x128xf32, #tpu.memory_space<vmem>>, vector<8x128xf32>
    %c6_i32 = arith.constant 6 : i32
    %23 = arith.addi %4, %c6_i32 : i32
    %24 = arith.index_cast %23 : i32 to index
    %c0_7 = arith.constant 0 : index
    %25 = tpu.strided_load %arg5[%24, %c0_7] {strides = array<i32: 4, 1>} : memref<67x128xf32, #tpu.memory_space<vmem>>, vector<8x128xf32>
    %26 = tpu.concatenate %7, %10, %13, %16, %19, %22, %25 in 1 : vector<8x128xf32>, vector<8x128xf32>, vector<8x128xf32>, vector<8x128xf32>, vector<8x128xf32>, vector<8x128xf32>, vector<8x128xf32> -> vector<8x896xf32>
    %c0_8 = arith.constant 0 : index
    %c0_9 = arith.constant 0 : index
    %27 = vector.load %arg3[%c0_8, %c0_9] : memref<896x256xf32, #tpu.memory_space<vmem>>, vector<896x256xf32>
    %cst = arith.constant dense<0.000000e+00> : vector<8x256xf32>
    %28 = tpu.matmul %26, %27, %cst {dimension_numbers = #tpu.dot_dimension_numbers<[1], [0], [0], [1], [0, 0, 1, 1], [], []>} : vector<8x896xf32>, vector<896x256xf32>, vector<8x256xf32> -> vector<8x256xf32>
    %c0_10 = arith.constant 0 : index
    %c0_11 = arith.constant 0 : index
    %c0_12 = arith.constant 0 : index
    %29 = vector.load %arg4[%c0_10, %c0_11, %c0_12] : memref<1x8x256xf32, #tpu.memory_space<vmem>>, vector<1x8x256xf32>
    %30 = vector.shape_cast %29 : vector<1x8x256xf32> to vector<8x256xf32>
    %31 = vector.shape_cast %28 : vector<8x256xf32> to vector<1x8x256xf32>
    tpu.vector_store %arg4[%c0_10, %c0_11, %c0_12], %31 {strides = array<i32>} : memref<1x8x256xf32, #tpu.memory_space<vmem>>, vector<1x8x256xf32>,
    return
  }
  func.func @transform_0(%arg0: i32, %arg1: i32) -> (i32, i32, i32) {
    %c0_i32 = arith.constant 0 : i32
    %c0_i32_0 = arith.constant 0 : i32
    %c0_i32_1 = arith.constant 0 : i32
    return %arg0, %c0_i32, %c0_i32_0 : i32, i32, i32
  }
  func.func @transform_1(%arg0: i32, %arg1: i32) -> (i32, i32) {
    %c0_i32 = arith.constant 0 : i32
    %c0_i32_0 = arith.constant 0 : i32
    %c0_i32_1 = arith.constant 0 : i32
    return %c0_i32, %c0_i32_0 : i32, i32
  }
  func.func @transform_2(%arg0: i32, %arg1: i32) -> (i32, i32, i32) {
    %c0_i32 = arith.constant 0 : i32
    %c0_i32_0 = arith.constant 0 : i32
    return %arg0, %arg1, %c0_i32 : i32, i32, i32
  }
}

</mosaic_0001>

<bundles_post_ra>
// kernel: tpu_custom_call.1
= control target key start
LH: loop header
LB: loop body
LE: loop exit
PB: predicated region body
PF: predicated region fallthrough
CT: control target
= control target key end

     0   :  { %7 = vsyncpa [#allocation4], 0  ;;  %s1535_s0 = inlined_call_operand.vmem [shape: f32[2,63,128], index: 0, kind: input, shape index: {}]   ;;  %s1536_s1 = inlined_call_operand.hbm [shape: f32[896,256], index: 1, kind: input, shape index: {}]   ;;  %s1537_s2 = inlined_call_operand.hbm [shape: f32[2,16,256], index: 2, kind: output, shape index: {}]  }
   0x1   :  { %8 = vsyncpa [#allocation5], 0 }
   0x2   :  { %10 = vsyncpa [#allocation5 + $0x1], 0  ;;  %s1342_s9 = smov 0   ;;  %s1344_s10 = smov 0  }
   0x3   :  { %s1346_s11 = smov 0   ;;  %s1348_s12 = smov 0  }
   0x4   :  { %s1350_s13 = smov 0   ;;  %s1352_s14 = smov 0  }
   0x5   :  { %s1354_s15 = smov 0   ;;  %s1356_s16 = smov 0  }
   0x6 LB: > { %s846_s17 = sadd.s32 4294967295, %s1319_s16   ;;  %s847_s18 = sadd.s32 4294967294, %s1319_s16   ;;  %s1319_s16 = sphi %s1356_s16, %s16_s16   ;;  %s1315_s15 = sphi %s1354_s15, %s1557_s15   ;;  %s1311_s14 = sphi %s1352_s14, %s1556_s14   ;;  %s1307_s13 = sphi %s1350_s13, %s1555_s13   ;;  %s1303_s12 = sphi %s1348_s12, %s1554_s12   ;;  %s1299_s11 = sphi %s1346_s11, %s1553_s11   ;;  %s1295_s10 = sphi %s1344_s10, %s1552_s10   ;;  %s1291_s9 = sphi %s1342_s9, %s1551_s9  }
   0x7   : > { %s25_s19 = sadd.s32 1, %s1311_s14  ;;  %s28_s20 = sadd.s32 1, %s1315_s15 }
   0x8   : > { %p26_p0 = scmp.ge.s32.totalorder %s25_s19, 2  ;;  %s84_s21 = sadd.s32 1, %s1299_s11 }
   0x9   : > { %p94_p1 = scmp.ne.s32.totalorder %s1299_s11, %s1295_s10  ;;  %p95_p2 = scmp.eq.s32.totalorder %s846_s17, 3 }
   0xa   : > { %s1559_s19 = smov (%p26_p0, %s25_s19), 0  ;;  %s1561_s20 = smov (!%p26_p0, %s28_s20), %s1315_s15 }
   0xb   : > { %s80_s22 = ssub.s32 %s1311_s14, %s1559_s19  ;;  %p1394_p3 = por %p95_p2, %p94_p1 }
   0xc   : > { %p30_p4 = scmp.ge.s32.totalorder %s1561_s20, 2  ;;  %p100_p5 = scmp.ne.s32.totalorder %s1295_s10, %s1291_s9 }
   0xd   : > { %s1542_s23 = scalar_select %p1394_p3, 1, 0 }
   0xe   : > { %p101_p6 = scmp.eq.s32.totalorder %s847_s18, 3  ;;  %p848_p7 = scmp.ge.s32.totalorder %s1319_s16, 1 }
   0xf   : > { %s1563_s20 = smov (%p30_p4, %s1561_s20), 0  ;;  %p108_p9 = scmp.lt.s32.totalorder %s1319_s16, 5 }
  0x10   : > { %p1403_p8 = por %p101_p6, %p100_p5  ;;  %s79_s25 = ssub.s32 %s1315_s15, %s1563_s20 }
  0x11   : > { %s81_s26 = sor.u32 %s80_s22, %s79_s25  ;;  %p1410_p10 = pnand %p848_p7, %p108_p9 }
  0x12   : > { %s1543_s24 = scalar_select %p1403_p8, 1, 0 }
  0x13   : > { %s1544_s27 = scalar_select %p1410_p10, 1, 0 }
  0x14   : > { %p82_p11 = scmp.eq.s32.totalorder %s81_s26, 0  ;;  %p1414_p12 = scmp.eq.s32.totalorder %s846_s17, 0 }
  0x15   : > { %p1113_p13 = pneg %p1410_p10  ;;  %s1321_s30 = smov [#allocation3]  }
  0x16   : > { %s1545_s28 = scalar_select %p1414_p12, 1, 0 }
  0x17   : > { %s1421_s29 = scalar_select %p82_p11, %s1299_s11, %s84_s21  }
  0x18   : > { %s120_s3 = sshll.u32 %s1321_s30, 4  ;;  %p1425_p0 = pnand %p1414_p12, %p1113_p13  ;;  %s121_s3 = int_to_ptr.vmem [resolvable:$true] %s120_s3 }
  0x19   : > { %s1193_s7 = scalar_lea.hbm %s1536_s1, 28672 }
  0x1a   : > { %p1194_p1 = scmp.ne.s32.totalorder %s1536_s1, %s1193_s7  ;;  %p1195_p2 = pneg %p1425_p0 }
  0x1b   : > { %p1200_p6 = scmp.lt.u32.totalorder %s1193_s7, %s1536_s1 }
  0x1c   : > { %p1196_p4 = pnand %p1195_p2, %p1194_p1 }
  0x1e   : > { %p1197_p5 = pneg %p1196_p4 }
  0x20   : > { %p1202_p7 = pnand %p1200_p6, %p1197_p5 }
  0x22   : > { %1205 = shalt.err (!%p1202_p7)
}
  0x23   : > { %s1206_s22 = scalar_lea.vmem %s121_s3, 28672  ;;  %p1214_p8 = scmp.lt.s32.totalorder %s121_s3, %s121_s3 }
  0x24   : > { %p1207_p9 = scmp.ne.s32.totalorder %s121_s3, %s1206_s22  ;;  %p1215_p3 = scmp.lt.s32.totalorder %s1206_s22, %s1206_s22 }
  0x26   : > { %p1209_p11 = pnand %p1207_p9, %p1195_p2  ;;  %p1216_p12 = por %p1215_p3, %p1214_p8 }
  0x28   : > { %p1210_p13 = pneg %p1209_p11 }
  0x2a   : > { %p1217_p10 = pnand %p1216_p12, %p1210_p13 }
  0x2c   : > { %1220 = shalt.err (!%p1217_p10)
}
  0x2d   : > { %s1322_s25 = smov 256   ;;  %s1323_s26 = smov 16  }
  0x2e   : > { %1116 = dma.hbm_to_vmem [thread:$0]  (!%p1425_p0), %s1536_s1, 28672, %s121_s3, [#allocation4], %s1322_s25, %s1322_s25, %s1323_s26  }
  0x2f   : > { %p1547_p1 = scmp.ne.s32.totalorder %s1544_s27, 0 }
  0x30   : > { %p1548_p4 = scmp.ne.s32.totalorder (!%p1547_p1), %s1545_s28, 0 }
  0x31   : > { %144 = sbr.rel (%p1547_p1) target bundleno = 428 (0x1ac), region = 28 }
  0x38   : > { %1282 = dma.done.wait (%p1548_p4), [#allocation4], 28672  }
  0x39   : > { %1284 = vsyncadd (%p1548_p4), [#allocation4], 4294938624  ;;  %s163_s6 = sand.u32 1, %s1295_s10   ;;  %p166_p3 = scmp.lt.s32.totalorder %s1307_s13, 1 }
  0x3a   : > { %s853_s4 = sshll.u32 %s163_s6, 4  ;;  %p856_p8 = scmp.ne.s32.totalorder %s1303_s12, 0 }
  0x3b   : > { %s167_s7 = scalar_select %p166_p3, %s1307_s13, 1 }
  0x3c   : > { %s1459_s18 = scalar_lea.vmem [#allocation6], %s853_s4  ;;  %174 = sbr.rel (%p856_p8) target bundleno = 68 (0x44), region = 36  ;;  %v1324_v3 = vmov (!%p856_p8), 0.0  }
  0x3d   : > { %s876_s8 = sshll.u32 %s167_s7, 6  ;;  %175 = vst [vmem:[#allocation2] sm:$0x3] (!%p856_p8), %v1324_v3  ;;  %176 = vst [vmem:[#allocation2 + $0x41] sm:$0x3] (!%p856_p8), %v1324_v3 }
  0x3e   : > { %s170_s27 = scalar_lea.vmem %s1535_s0, %s876_s8 }
  0x3f   : > { %v177_v0 = vld [vmem:[%s170_s27] sm:$0xff] (!%p856_p8)  ;;  %v178_v1 = vld [vmem:[%s170_s27 + $0x8] sm:$0xff] (!%p856_p8)  ;;  %v179_v2 = vld [vmem:[%s170_s27 + $0x10] sm:$0xff] (!%p856_p8) }
  0x40   : > { %185 = vst [vmem:[#allocation2 + $0x2] sm:$0xff] (!%p856_p8), %v177_v0  ;;  %186 = vst [vmem:[#allocation2 + $0xa] sm:$0xff] (!%p856_p8), %v178_v1  ;;  %v180_v4 = vld [vmem:[%s170_s27 + $0x18] sm:$0xff] (!%p856_p8)  ;;  %v181_v5 = vld [vmem:[%s170_s27 + $0x20] sm:$0xff] (!%p856_p8) }
  0x41   : > { %187 = vst [vmem:[#allocation2 + $0x12] sm:$0xff] (!%p856_p8), %v179_v2  ;;  %v182_v6 = vld [vmem:[%s170_s27 + $0x28] sm:$0xff] (!%p856_p8)  ;;  %188 = vst [vmem:[#allocation2 + $0x1a] sm:$0xff] (!%p856_p8), %v180_v4  ;;  %v183_v7 = vld [vmem:[%s170_s27 + $0x30] sm:$0xff] (!%p856_p8) }
  0x42   : > { %189 = vst [vmem:[#allocation2 + $0x22] sm:$0xff] (!%p856_p8), %v181_v5  ;;  %190 = vst [vmem:[#allocation2 + $0x2a] sm:$0xff] (!%p856_p8), %v182_v6  ;;  %v184_v8 = vld [vmem:[%s170_s27 + $0x38] sm:$0x7f] (!%p856_p8) }
  0x43   : > { %191 = vst [vmem:[#allocation2 + $0x32] sm:$0xff] %v183_v7  ;;  %192 = vst [vmem:[#allocation2 + $0x3a] sm:$0x7f] %v184_v8 }
  0x44 PF: > { %v215_v9 = vld [vmem:[#allocation3 + $0x8] sm:$0xff]  ;;  %v217_v10 = vld [vmem:[#allocation3 + $0x18] sm:$0xff]  ;;  %v214_v14 = vld [vmem:[#allocation3] sm:$0xff]  ;;  %s857_s28 = sshll.u32 %s1303_s12, 5  ;;  %s871_s22 = sshll.u32 %s1303_s12, 1 }
  0x45   : > { %v343_v11 = vld [vmem:[#allocation3 + $0x408] sm:$0xff]  ;;  %v877_v12 = vpack.c.bf16 %v217_v10, %v215_v9  ;;  %v345_v13 = vld [vmem:[#allocation3 + $0x418] sm:$0xff]  ;;  %v216_v15 = vld [vmem:[#allocation3 + $0x10] sm:$0xff]  ;;  %s1463_s21 = scalar_lea.vmem [#allocation2], %s857_s28  ;;  %s872_s25 = sshll.u32 %s1307_s13, 2 }
  0x46   : > { %v1005_v16 = vpack.c.bf16 %v345_v13, %v343_v11  ;;  %v879_v17 = vpack.c.bf16 %v216_v15, %v214_v14  ;;  %v342_v18 = vld [vmem:[#allocation3 + $0x400] sm:$0xff]  ;;  %v344_v19 = vld [vmem:[#allocation3 + $0x410] sm:$0xff]  ;;  %v219_v20 = vld [vmem:[#allocation3 + $0x28] sm:$0xff]  ;;  %s737_s26 = sadd.s32 %s872_s25, %s871_s22  ;;  %s741_s5 = sshll.u32 %s1459_s18, 4  ;;  %s1480_s5 = int_to_ptr.vmem [resolvable:$true] %s741_s5 }
  0x47   : > { %878 = vmatprep.subr.bf16.mxu1 %v877_v12  ;;  %v1007_v21 = vpack.c.bf16 %v344_v19, %v342_v18  ;;  %v221_v22 = vld [vmem:[#allocation3 + $0x38] sm:$0xff]  ;;  %v347_v23 = vld [vmem:[#allocation3 + $0x428] sm:$0xff]  ;;  %v218_v27 = vld [vmem:[#allocation3 + $0x20] sm:$0xff]  ;;  %s873_s30 = sshll.u32 %s737_s26, 7  ;;  %s725_s12 = scalar_lea.sflag [#allocation5], %s163_s6 }
  0x48   : > { %v349_v24 = vld [vmem:[#allocation3 + $0x438] sm:$0xff]  ;;  %1006 = vmatprep.subr.bf16.mxu0 %v1005_v16  ;;  %880 = vmatpush1.bf16.msra.mxu1 %v879_v17  ;;  %v881_v25 = vpack.c.bf16 %v221_v22, %v219_v20  ;;  %v220_v28 = vld [vmem:[#allocation3 + $0x30] sm:$0xff]  ;;  %v346_v29 = vld [vmem:[#allocation3 + $0x420] sm:$0xff]  ;;  %s1478_s8 = scalar_lea.hbm %s1537_s2, %s873_s30  ;;  %s1221_s13 = scalar_lea.vmem %s1480_s5, 256 }
  0x49   : > { %v1009_v26 = vpack.c.bf16 %v349_v24, %v347_v23  ;;  %1008 = vmatpush1.bf16.msra.mxu0 %v1007_v21  ;;  %v883_v30 = vpack.c.bf16 %v220_v28, %v218_v27  ;;  %v348_v31 = vld [vmem:[#allocation3 + $0x430] sm:$0xff]  ;;  %v223_v32 = vld [vmem:[#allocation3 + $0x48] sm:$0xff]  ;;  %v225_v33 = vld [vmem:[#allocation3 + $0x58] sm:$0xff]  ;;  %p1222_p10 = scmp.ne.s32.totalorder %s1480_s5, %s1221_s13  ;;  %p1549_p12 = scmp.ne.s32.totalorder %s1542_s23, 0 }
  0x4a   : > { %882 = vmatprep.subr.bf16.mxu1 %v881_v25  ;;  %v1011_v34 = vpack.c.bf16 %v348_v31, %v346_v29  ;;  %v885_v35 = vpack.c.bf16 %v225_v33, %v223_v32  ;;  %v351_v36 = vld [vmem:[#allocation3 + $0x448] sm:$0xff]  ;;  %v353_v37 = vld [vmem:[#allocation3 + $0x458] sm:$0xff]  ;;  %v222_v38 = vld [vmem:[#allocation3 + $0x40] sm:$0xff]  ;;  %s1326_s3 = smov [#allocation6]  }
  0x4b   : > { %1010 = vmatprep.subr.bf16.mxu0 %v1009_v26  ;;  %v1013_v39 = vpack.c.bf16 %v353_v37, %v351_v36  ;;  %v224_v40 = vld [vmem:[#allocation3 + $0x50] sm:$0xff]  ;;  %v350_v41 = vld [vmem:[#allocation3 + $0x440] sm:$0xff]  ;;  %v227_v44 = vld [vmem:[#allocation3 + $0x68] sm:$0xff]  ;;  %p1223_p0 = pnand %p1222_p10, %p1549_p12  ;;  %s1225_s17 = sshll.u32 %s1326_s3, 4  ;;  %s1226_s17 = int_to_ptr.vmem [resolvable:$false] %s1225_s17 }
  0x4c   : > { %v352_v42 = vld [vmem:[#allocation3 + $0x450] sm:$0xff]  ;;  %884 = vmatpush1.bf16.msra.mxu1 %v883_v30  ;;  %v887_v43 = vpack.c.bf16 %v224_v40, %v222_v38  ;;  %v229_v45 = vld [vmem:[#allocation3 + $0x78] sm:$0xff]  ;;  %v355_v46 = vld [vmem:[#allocation3 + $0x468] sm:$0xff]  ;;  %s1227_s27 = scalar_lea.vmem %s1226_s17, 512  ;;  %p1228_p5 = scmp.lt.s32.totalorder %s1480_s5, %s1226_s17 }
  0x4d   : > { %1012 = vmatpush1.bf16.msra.mxu0 %v1011_v34  ;;  %886 = vmatprep.subr.bf16.mxu1 %v885_v35  ;;  %v1015_v47 = vpack.c.bf16 %v352_v42, %v350_v41  ;;  %v889_v48 = vpack.c.bf16 %v229_v45, %v227_v44  ;;  %v357_v49 = vld [vmem:[#allocation3 + $0x478] sm:$0xff]  ;;  %v226_v50 = vld [vmem:[#allocation3 + $0x60] sm:$0xff]  ;;  %v228_v51 = vld [vmem:[#allocation3 + $0x70] sm:$0xff]  ;;  %p1224_p2 = pneg %p1223_p0  ;;  %p1229_p6 = scmp.lt.s32.totalorder %s1227_s27, %s1221_s13 }
  0x4e   : > { %1014 = vmatprep.subr.bf16.mxu0 %v1013_v39  ;;  %v1017_v52 = vpack.c.bf16 %v357_v49, %v355_v46  ;;  %v354_v53 = vld [vmem:[#allocation3 + $0x460] sm:$0xff]  ;;  %v356_v54 = vld [vmem:[#allocation3 + $0x470] sm:$0xff]  ;;  %v231_v55 = vld [vmem:[#allocation3 + $0x88] sm:$0xff]  ;;  %v891_v59 = vpack.c.bf16 %v228_v51, %v226_v50 }
  0x4f   : > { %v233_v56 = vld [vmem:[#allocation3 + $0x98] sm:$0xff]  ;;  %v359_v57 = vld [vmem:[#allocation3 + $0x488] sm:$0xff]  ;;  %v1019_v60 = vpack.c.bf16 %v356_v54, %v354_v53  ;;  %v230_v62 = vld [vmem:[#allocation3 + $0x80] sm:$0xff]  ;;  %p1230_p7 = por %p1229_p6, %p1228_p5 }
  0x50   : > { %v361_v58 = vld [vmem:[#allocation3 + $0x498] sm:$0xff]  ;;  %888 = vmatpush1.bf16.msra.mxu1 %v887_v43  ;;  %v893_v61 = vpack.c.bf16 %v233_v56, %v231_v55  ;;  %v232_v63 = vld [vmem:[#allocation3 + $0x90] sm:$0xff]  ;;  %v358_v0 = vld [vmem:[#allocation3 + $0x480] sm:$0xff] }
  0x51   : > { %1016 = vmatpush1.bf16.msra.mxu0 %v1015_v47  ;;  %890 = vmatprep.subr.bf16.mxu1 %v889_v48  ;;  %v1021_v1 = vpack.c.bf16 %v361_v58, %v359_v57  ;;  %v360_v2 = vld [vmem:[#allocation3 + $0x490] sm:$0xff]  ;;  %v235_v3 = vld [vmem:[#allocation3 + $0xa8] sm:$0xff]  ;;  %v237_v4 = vld [vmem:[#allocation3 + $0xb8] sm:$0xff]  ;;  %v895_v7 = vpack.c.bf16 %v232_v63, %v230_v62  ;;  %p1231_p9 = pnand %p1230_p7, %p1224_p2 }
  0x52   : > { %1018 = vmatprep.subr.bf16.mxu0 %v1017_v52  ;;  %v363_v5 = vld [vmem:[#allocation3 + $0x4a8] sm:$0xff]  ;;  %v365_v6 = vld [vmem:[#allocation3 + $0x4b8] sm:$0xff]  ;;  %v1023_v8 = vpack.c.bf16 %v360_v2, %v358_v0  ;;  %v897_v9 = vpack.c.bf16 %v237_v4, %v235_v3  ;;  %v234_v10 = vld [vmem:[#allocation3 + $0xa0] sm:$0xff] }
  0x53   : > { %v236_v11 = vld [vmem:[#allocation3 + $0xb0] sm:$0xff]  ;;  %v362_v12 = vld [vmem:[#allocation3 + $0x4a0] sm:$0xff]  ;;  %v1025_v13 = vpack.c.bf16 %v365_v6, %v363_v5  ;;  %v239_v15 = vld [vmem:[#allocation3 + $0xc8] sm:$0xff] }
  0x54   : > { %892 = vmatpush1.bf16.msra.mxu1 %v891_v59  ;;  %v364_v14 = vld [vmem:[#allocation3 + $0x4b0] sm:$0xff]  ;;  %v241_v16 = vld [vmem:[#allocation3 + $0xd8] sm:$0xff]  ;;  %v367_v17 = vld [vmem:[#allocation3 + $0x4c8] sm:$0xff]  ;;  %v899_v19 = vpack.c.bf16 %v236_v11, %v234_v10 }
  0x55   : > { %1020 = vmatpush1.bf16.msra.mxu0 %v1019_v60  ;;  %894 = vmatprep.subr.bf16.mxu1 %v893_v61  ;;  %v369_v18 = vld [vmem:[#allocation3 + $0x4d8] sm:$0xff]  ;;  %v1027_v20 = vpack.c.bf16 %v364_v14, %v362_v12  ;;  %v901_v21 = vpack.c.bf16 %v241_v16, %v239_v15  ;;  %v238_v22 = vld [vmem:[#allocation3 + $0xc0] sm:$0xff]  ;;  %v240_v23 = vld [vmem:[#allocation3 + $0xd0] sm:$0xff] }
  0x56   : > { %1022 = vmatprep.subr.bf16.mxu0 %v1021_v1  ;;  %v366_v24 = vld [vmem:[#allocation3 + $0x4c0] sm:$0xff]  ;;  %v1029_v25 = vpack.c.bf16 %v369_v18, %v367_v17  ;;  %v368_v26 = vld [vmem:[#allocation3 + $0x4d0] sm:$0xff]  ;;  %v243_v27 = vld [vmem:[#allocation3 + $0xe8] sm:$0xff]  ;;  %v903_v31 = vpack.c.bf16 %v240_v23, %v238_v22 }
  0x57   : > { %v245_v28 = vld [vmem:[#allocation3 + $0xf8] sm:$0xff]  ;;  %v371_v29 = vld [vmem:[#allocation3 + $0x4e8] sm:$0xff]  ;;  %v1031_v32 = vpack.c.bf16 %v368_v26, %v366_v24  ;;  %v242_v34 = vld [vmem:[#allocation3 + $0xe0] sm:$0xff] }
  0x58   : > { %896 = vmatpush1.bf16.msra.mxu1 %v895_v7  ;;  %v373_v30 = vld [vmem:[#allocation3 + $0x4f8] sm:$0xff]  ;;  %v905_v33 = vpack.c.bf16 %v245_v28, %v243_v27  ;;  %v244_v35 = vld [vmem:[#allocation3 + $0xf0] sm:$0xff]  ;;  %v370_v36 = vld [vmem:[#allocation3 + $0x4e0] sm:$0xff] }
  0x59   : > { %1024 = vmatpush1.bf16.msra.mxu0 %v1023_v8  ;;  %898 = vmatprep.subr.bf16.mxu1 %v897_v9  ;;  %v1033_v37 = vpack.c.bf16 %v373_v30, %v371_v29  ;;  %v372_v38 = vld [vmem:[#allocation3 + $0x4f0] sm:$0xff]  ;;  %v247_v39 = vld [vmem:[#allocation3 + $0x108] sm:$0xff]  ;;  %v249_v40 = vld [vmem:[#allocation3 + $0x118] sm:$0xff]  ;;  %v907_v43 = vpack.c.bf16 %v244_v35, %v242_v34 }
  0x5a   : > { %1026 = vmatprep.subr.bf16.mxu0 %v1025_v13  ;;  %v375_v41 = vld [vmem:[#allocation3 + $0x508] sm:$0xff]  ;;  %v377_v42 = vld [vmem:[#allocation3 + $0x518] sm:$0xff]  ;;  %v1035_v44 = vpack.c.bf16 %v372_v38, %v370_v36  ;;  %v909_v45 = vpack.c.bf16 %v249_v40, %v247_v39  ;;  %v246_v46 = vld [vmem:[#allocation3 + $0x100] sm:$0xff] }
  0x5b   : > { %v248_v47 = vld [vmem:[#allocation3 + $0x110] sm:$0xff]  ;;  %v374_v48 = vld [vmem:[#allocation3 + $0x500] sm:$0xff]  ;;  %v1037_v49 = vpack.c.bf16 %v377_v42, %v375_v41  ;;  %v251_v51 = vld [vmem:[#allocation3 + $0x128] sm:$0xff] }
  0x5c   : > { %900 = vmatpush1.bf16.msra.mxu1 %v899_v19  ;;  %v376_v50 = vld [vmem:[#allocation3 + $0x510] sm:$0xff]  ;;  %v253_v52 = vld [vmem:[#allocation3 + $0x138] sm:$0xff]  ;;  %v379_v53 = vld [vmem:[#allocation3 + $0x528] sm:$0xff]  ;;  %v911_v55 = vpack.c.bf16 %v248_v47, %v246_v46 }
  0x5d   : > { %1028 = vmatpush1.bf16.msra.mxu0 %v1027_v20  ;;  %902 = vmatprep.subr.bf16.mxu1 %v901_v21  ;;  %v381_v54 = vld [vmem:[#allocation3 + $0x538] sm:$0xff]  ;;  %v1039_v56 = vpack.c.bf16 %v376_v50, %v374_v48  ;;  %v913_v57 = vpack.c.bf16 %v253_v52, %v251_v51  ;;  %v250_v58 = vld [vmem:[#allocation3 + $0x120] sm:$0xff]  ;;  %v252_v59 = vld [vmem:[#allocation3 + $0x130] sm:$0xff] }
  0x5e   : > { %1030 = vmatprep.subr.bf16.mxu0 %v1029_v25  ;;  %v378_v60 = vld [vmem:[#allocation3 + $0x520] sm:$0xff]  ;;  %v1041_v61 = vpack.c.bf16 %v381_v54, %v379_v53  ;;  %v380_v62 = vld [vmem:[#allocation3 + $0x530] sm:$0xff]  ;;  %v255_v63 = vld [vmem:[#allocation3 + $0x148] sm:$0xff]  ;;  %v915_v3 = vpack.c.bf16 %v252_v59, %v250_v58 }
  0x5f   : > { %v257_v0 = vld [vmem:[#allocation3 + $0x158] sm:$0xff]  ;;  %v383_v1 = vld [vmem:[#allocation3 + $0x548] sm:$0xff]  ;;  %v1043_v4 = vpack.c.bf16 %v380_v62, %v378_v60  ;;  %v254_v6 = vld [vmem:[#allocation3 + $0x140] sm:$0xff] }
  0x60   : > { %904 = vmatpush1.bf16.msra.mxu1 %v903_v31  ;;  %v385_v2 = vld [vmem:[#allocation3 + $0x558] sm:$0xff]  ;;  %v917_v5 = vpack.c.bf16 %v257_v0, %v255_v63  ;;  %v256_v7 = vld [vmem:[#allocation3 + $0x150] sm:$0xff]  ;;  %v382_v8 = vld [vmem:[#allocation3 + $0x540] sm:$0xff] }
  0x61   : > { %1032 = vmatpush1.bf16.msra.mxu0 %v1031_v32  ;;  %906 = vmatprep.subr.bf16.mxu1 %v905_v33  ;;  %v1045_v9 = vpack.c.bf16 %v385_v2, %v383_v1  ;;  %v384_v10 = vld [vmem:[#allocation3 + $0x550] sm:$0xff]  ;;  %v259_v11 = vld [vmem:[#allocation3 + $0x168] sm:$0xff]  ;;  %v261_v12 = vld [vmem:[#allocation3 + $0x178] sm:$0xff]  ;;  %v919_v15 = vpack.c.bf16 %v256_v7, %v254_v6 }
  0x62   : > { %1034 = vmatprep.subr.bf16.mxu0 %v1033_v37  ;;  %v387_v13 = vld [vmem:[#allocation3 + $0x568] sm:$0xff]  ;;  %v389_v14 = vld [vmem:[#allocation3 + $0x578] sm:$0xff]  ;;  %v258_v16 = vld [vmem:[#allocation3 + $0x160] sm:$0xff]  ;;  %v1047_v17 = vpack.c.bf16 %v384_v10, %v382_v8  ;;  %v921_v18 = vpack.c.bf16 %v261_v12, %v259_v11 }
  0x63   : > { %v260_v19 = vld [vmem:[#allocation3 + $0x170] sm:$0xff]  ;;  %v386_v20 = vld [vmem:[#allocation3 + $0x560] sm:$0xff]  ;;  %v1049_v22 = vpack.c.bf16 %v389_v14, %v387_v13  ;;  %v263_v23 = vld [vmem:[#allocation3 + $0x188] sm:$0xff] }
  0x64   : > { %908 = vmatpush1.bf16.msra.mxu1 %v907_v43  ;;  %v388_v21 = vld [vmem:[#allocation3 + $0x570] sm:$0xff]  ;;  %v265_v24 = vld [vmem:[#allocation3 + $0x198] sm:$0xff]  ;;  %v391_v26 = vld [vmem:[#allocation3 + $0x588] sm:$0xff]  ;;  %v923_v29 = vpack.c.bf16 %v260_v19, %v258_v16 }
  0x65   : > { %1036 = vmatpush1.bf16.msra.mxu0 %v1035_v44  ;;  %910 = vmatprep.subr.bf16.mxu1 %v909_v45  ;;  %v859_v25 = vld [vmem:[%s1463_s21 + $0x1] ss:$4 sm:$0xff]  ;;  %v1051_v30 = vpack.c.bf16 %v388_v21, %v386_v20  ;;  %v925_v31 = vpack.c.bf16 %v265_v24, %v263_v23 }
  0x66   : > { %1038 = vmatprep.subr.bf16.mxu0 %v1037_v49  ;;  %v393_v27 = vld [vmem:[#allocation3 + $0x598] sm:$0xff]  ;;  %502 = vmatprep.mubr.f32.mxu1 %v859_v25  ;;  %v262_v32 = vld [vmem:[#allocation3 + $0x180] sm:$0xff]  ;;  %v264_v33 = vld [vmem:[#allocation3 + $0x190] sm:$0xff] }
  0x67   : > { %v867_v28 = vld [vmem:[%s1463_s21 + $0x5] ss:$4 sm:$0xff]  ;;  %v1053_v35 = vpack.c.bf16 %v393_v27, %v391_v26  ;;  %v927_v41 = vpack.c.bf16 %v264_v33, %v262_v32  ;;  %v195_v25 = vld [vmem:[%s1463_s21] ss:$4 sm:$0xff] }
  0x68   : > { %912 = vmatpush1.bf16.msra.mxu1 %v911_v55  ;;  %644 = vmatprep.mubr.f32.mxu0 %v867_v28  ;;  %v390_v34 = vld [vmem:[#allocation3 + $0x580] sm:$0xff]  ;;  %v392_v36 = vld [vmem:[#allocation3 + $0x590] sm:$0xff]  ;;  %v267_v37 = vld [vmem:[#allocation3 + $0x1a8] sm:$0xff] }
  0x69   : > { %1040 = vmatpush1.bf16.msra.mxu0 %v1039_v56  ;;  %914 = vmatprep.subr.bf16.mxu1 %v913_v57  ;;  %v269_v38 = vld [vmem:[#allocation3 + $0x1b8] sm:$0xff]  ;;  %v395_v39 = vld [vmem:[#allocation3 + $0x5a8] sm:$0xff]  ;;  %v1055_v42 = vpack.c.bf16 %v392_v36, %v390_v34  ;;  %v266_v44 = vld [vmem:[#allocation3 + $0x1a0] sm:$0xff] }
  0x6a   : > { %1042 = vmatprep.subr.bf16.mxu0 %v1041_v61  ;;  %v397_v40 = vld [vmem:[#allocation3 + $0x5b8] sm:$0xff]  ;;  %v929_v43 = vpack.c.bf16 %v269_v38, %v267_v37  ;;  %v268_v45 = vld [vmem:[#allocation3 + $0x1b0] sm:$0xff]  ;;  %v394_v46 = vld [vmem:[#allocation3 + $0x5a0] sm:$0xff] }
  0x6b   : > { %v1057_v47 = vpack.c.bf16 %v397_v40, %v395_v39  ;;  %v396_v48 = vld [vmem:[#allocation3 + $0x5b0] sm:$0xff]  ;;  %v271_v49 = vld [vmem:[#allocation3 + $0x1c8] sm:$0xff]  ;;  %v273_v50 = vld [vmem:[#allocation3 + $0x1d8] sm:$0xff]  ;;  %v931_v53 = vpack.c.bf16 %v268_v45, %v266_v44 }
  0x6c   : > { %916 = vmatpush1.bf16.msra.mxu1 %v915_v3  ;;  %v399_v51 = vld [vmem:[#allocation3 + $0x5c8] sm:$0xff]  ;;  %v401_v52 = vld [vmem:[#allocation3 + $0x5d8] sm:$0xff]  ;;  %v1059_v54 = vpack.c.bf16 %v396_v48, %v394_v46  ;;  %v933_v55 = vpack.c.bf16 %v273_v50, %v271_v49  ;;  %v270_v56 = vld [vmem:[#allocation3 + $0x1c0] sm:$0xff]  ;;  %v1325_v49 = vmov 0.0  }
  0x6d   : > { %1044 = vmatpush1.bf16.msra.mxu0 %v1043_v4  ;;  %918 = vmatprep.subr.bf16.mxu1 %v917_v5  ;;  %v272_v57 = vld [vmem:[#allocation3 + $0x1d0] sm:$0xff]  ;;  %v398_v58 = vld [vmem:[#allocation3 + $0x5c0] sm:$0xff]  ;;  %v1061_v59 = vpack.c.bf16 %v401_v52, %v399_v51  ;;  %v275_v61 = vld [vmem:[#allocation3 + $0x1e8] sm:$0xff] }
  0x6e   : > { %1046 = vmatprep.subr.bf16.mxu0 %v1045_v9  ;;  %v400_v60 = vld [vmem:[#allocation3 + $0x5d0] sm:$0xff]  ;;  %v277_v62 = vld [vmem:[#allocation3 + $0x1f8] sm:$0xff]  ;;  %v403_v63 = vld [vmem:[#allocation3 + $0x5e8] sm:$0xff]  ;;  %v935_v1 = vpack.c.bf16 %v272_v57, %v270_v56 }
  0x6f   : > { %v405_v0 = vld [vmem:[#allocation3 + $0x5f8] sm:$0xff]  ;;  %v1063_v2 = vpack.c.bf16 %v400_v60, %v398_v58  ;;  %v937_v3 = vpack.c.bf16 %v277_v62, %v275_v61  ;;  %v274_v4 = vld [vmem:[#allocation3 + $0x1e0] sm:$0xff]  ;;  %v276_v5 = vld [vmem:[#allocation3 + $0x1f0] sm:$0xff] }
  0x70   : > { %920 = vmatpush1.bf16.msra.mxu1 %v919_v15  ;;  %v402_v6 = vld [vmem:[#allocation3 + $0x5e0] sm:$0xff]  ;;  %v1065_v7 = vpack.c.bf16 %v405_v0, %v403_v63  ;;  %v404_v8 = vld [vmem:[#allocation3 + $0x5f0] sm:$0xff]  ;;  %v279_v9 = vld [vmem:[#allocation3 + $0x208] sm:$0xff]  ;;  %v939_v13 = vpack.c.bf16 %v276_v5, %v274_v4 }
  0x71   : > { %1048 = vmatpush1.bf16.msra.mxu0 %v1047_v17  ;;  %922 = vmatprep.subr.bf16.mxu1 %v921_v18  ;;  %v281_v10 = vld [vmem:[#allocation3 + $0x218] sm:$0xff]  ;;  %v407_v11 = vld [vmem:[#allocation3 + $0x608] sm:$0xff]  ;;  %v1067_v14 = vpack.c.bf16 %v404_v8, %v402_v6  ;;  %v278_v16 = vld [vmem:[#allocation3 + $0x200] sm:$0xff] }
  0x72   : > { %1050 = vmatprep.subr.bf16.mxu0 %v1049_v22  ;;  %v409_v12 = vld [vmem:[#allocation3 + $0x618] sm:$0xff]  ;;  %v941_v15 = vpack.c.bf16 %v281_v10, %v279_v9  ;;  %v280_v17 = vld [vmem:[#allocation3 + $0x210] sm:$0xff]  ;;  %v406_v18 = vld [vmem:[#allocation3 + $0x600] sm:$0xff] }
  0x73   : > { %v1069_v19 = vpack.c.bf16 %v409_v12, %v407_v11  ;;  %v408_v20 = vld [vmem:[#allocation3 + $0x610] sm:$0xff]  ;;  %v283_v21 = vld [vmem:[#allocation3 + $0x228] sm:$0xff]  ;;  %v285_v22 = vld [vmem:[#allocation3 + $0x238] sm:$0xff]  ;;  %v943_v26 = vpack.c.bf16 %v280_v17, %v278_v16 }
  0x74   : > { %924 = vmatpush1.bf16.msra.mxu1 %v923_v29  ;;  %v411_v23 = vld [vmem:[#allocation3 + $0x628] sm:$0xff]  ;;  %v413_v24 = vld [vmem:[#allocation3 + $0x638] sm:$0xff]  ;;  %v1071_v28 = vpack.c.bf16 %v408_v20, %v406_v18  ;;  %v945_v29 = vpack.c.bf16 %v285_v22, %v283_v21  ;;  %v410_v32 = vld [vmem:[#allocation3 + $0x620] sm:$0xff] }
  0x75   : > { %1052 = vmatpush1.bf16.msra.mxu0 %v1051_v30  ;;  %926 = vmatprep.subr.bf16.mxu1 %v925_v31  ;;  %v865_v27 = vld [vmem:[%s1463_s21 + $0x4] ss:$4 sm:$0xff]  ;;  %v1073_v33 = vpack.c.bf16 %v413_v24, %v411_v23 }
  0x76   : > { %1054 = vmatprep.subr.bf16.mxu0 %v1053_v35  ;;  %v282_v30 = vld [vmem:[#allocation3 + $0x220] sm:$0xff]  ;;  %v284_v31 = vld [vmem:[#allocation3 + $0x230] sm:$0xff]  ;;  %v287_v35 = vld [vmem:[#allocation3 + $0x248] sm:$0xff] }
  0x77   : > { %v412_v34 = vld [vmem:[#allocation3 + $0x630] sm:$0xff]  ;;  %v289_v36 = vld [vmem:[#allocation3 + $0x258] sm:$0xff]  ;;  %v415_v37 = vld [vmem:[#allocation3 + $0x648] sm:$0xff]  ;;  %v947_v39 = vpack.c.bf16 %v284_v31, %v282_v30 }
  0x78   : > { %928 = vmatpush1.bf16.msra.mxu1 %v927_v41  ;;  %v417_v38 = vld [vmem:[#allocation3 + $0x658] sm:$0xff]  ;;  %v1075_v40 = vpack.c.bf16 %v412_v34, %v410_v32  ;;  %v949_v41 = vpack.c.bf16 %v289_v36, %v287_v35  ;;  %v414_v44 = vld [vmem:[#allocation3 + $0x640] sm:$0xff]  ;;  %v416_v46 = vld [vmem:[#allocation3 + $0x650] sm:$0xff] }
  0x79   : > { %1056 = vmatpush1.bf16.msra.mxu0 %v1055_v42  ;;  %930 = vmatprep.subr.bf16.mxu1 %v929_v43  ;;  %v286_v42 = vld [vmem:[#allocation3 + $0x240] sm:$0xff]  ;;  %v288_v43 = vld [vmem:[#allocation3 + $0x250] sm:$0xff]  ;;  %v1077_v45 = vpack.c.bf16 %v417_v38, %v415_v37  ;;  %v293_v48 = vld [vmem:[#allocation3 + $0x278] sm:$0xff] }
  0x7a   : > { %1058 = vmatprep.subr.bf16.mxu0 %v1057_v47  ;;  %v291_v47 = vld [vmem:[#allocation3 + $0x268] sm:$0xff]  ;;  %v421_v51 = vld [vmem:[#allocation3 + $0x678] sm:$0xff]  ;;  %v951_v52 = vpack.c.bf16 %v288_v43, %v286_v42  ;;  %v292_v56 = vld [vmem:[#allocation3 + $0x270] sm:$0xff] }
  0x7b   : > { %v419_v50 = vld [vmem:[#allocation3 + $0x668] sm:$0xff]  ;;  %v418_v57 = vld [vmem:[#allocation3 + $0x660] sm:$0xff]  ;;  %v297_v61 = vld [vmem:[#allocation3 + $0x298] sm:$0xff] }
  0x7c   : > { %932 = vmatpush1.bf16.msra.mxu1 %v931_v53  ;;  %v1079_v53 = vpack.c.bf16 %v416_v46, %v414_v44  ;;  %v1081_v58 = vpack.c.bf16 %v421_v51, %v419_v50  ;;  %v295_v60 = vld [vmem:[#allocation3 + $0x288] sm:$0xff]  ;;  %v425_v63 = vld [vmem:[#allocation3 + $0x698] sm:$0xff]  ;;  %v294_v4 = vld [vmem:[#allocation3 + $0x280] sm:$0xff] }
  0x7d   : > { %1060 = vmatpush1.bf16.msra.mxu0 %v1059_v54  ;;  %934 = vmatprep.subr.bf16.mxu1 %v933_v55  ;;  %v953_v54 = vpack.c.bf16 %v293_v48, %v291_v47  ;;  %v290_v55 = vld [vmem:[#allocation3 + $0x260] sm:$0xff]  ;;  %v423_v62 = vld [vmem:[#allocation3 + $0x688] sm:$0xff]  ;;  %v296_v5 = vld [vmem:[#allocation3 + $0x290] sm:$0xff] }
  0x7e   : > { %1062 = vmatprep.subr.bf16.mxu0 %v1061_v59  ;;  %v420_v59 = vld [vmem:[#allocation3 + $0x670] sm:$0xff]  ;;  %v955_v0 = vpack.c.bf16 %v292_v56, %v290_v55  ;;  %v422_v6 = vld [vmem:[#allocation3 + $0x680] sm:$0xff]  ;;  %v299_v9 = vld [vmem:[#allocation3 + $0x2a8] sm:$0xff] }
  0x7f   : > { %v424_v8 = vld [vmem:[#allocation3 + $0x690] sm:$0xff]  ;;  %v301_v10 = vld [vmem:[#allocation3 + $0x2b8] sm:$0xff]  ;;  %v427_v11 = vld [vmem:[#allocation3 + $0x6a8] sm:$0xff] }
  0x80   : > { %936 = vmatpush1.bf16.msra.mxu1 %v935_v1  ;;  %v863_v1 = vld [vmem:[%s1463_s21 + $0x3] ss:$4 sm:$0xff]  ;;  %v869_v55 = vld [vmem:[%s1463_s21 + $0x6] ss:$4 sm:$0xff] }
  0x81   : > { %1064 = vmatpush1.bf16.msra.mxu0 %v1063_v2  ;;  %938 = vmatprep.subr.bf16.mxu1 %v937_v3  ;;  %v1083_v2 = vpack.c.bf16 %v420_v59, %v418_v57  ;;  %v957_v3 = vpack.c.bf16 %v297_v61, %v295_v60  ;;  %v429_v12 = vld [vmem:[#allocation3 + $0x6b8] sm:$0xff]  ;;  %v298_v16 = vld [vmem:[#allocation3 + $0x2a0] sm:$0xff]  ;;  %v300_v17 = vld [vmem:[#allocation3 + $0x2b0] sm:$0xff] }
  0x82   : > { %1066 = vmatprep.subr.bf16.mxu0 %v1065_v7  ;;  %v1085_v7 = vpack.c.bf16 %v425_v63, %v423_v62  ;;  %v426_v18 = vld [vmem:[#allocation3 + $0x6a0] sm:$0xff]  ;;  %v428_v20 = vld [vmem:[#allocation3 + $0x6b0] sm:$0xff]  ;;  %v303_v21 = vld [vmem:[#allocation3 + $0x2c8] sm:$0xff] }
  0x83   : > { %v305_v22 = vld [vmem:[#allocation3 + $0x2d8] sm:$0xff]  ;;  %v431_v23 = vld [vmem:[#allocation3 + $0x6c8] sm:$0xff]  ;;  %v430_v30 = vld [vmem:[#allocation3 + $0x6c0] sm:$0xff] }
  0x84   : > { %940 = vmatpush1.bf16.msra.mxu1 %v939_v13  ;;  %v959_v13 = vpack.c.bf16 %v296_v5, %v294_v4  ;;  %v433_v24 = vld [vmem:[#allocation3 + $0x6d8] sm:$0xff]  ;;  %v432_v32 = vld [vmem:[#allocation3 + $0x6d0] sm:$0xff]  ;;  %v435_v35 = vld [vmem:[#allocation3 + $0x6e8] sm:$0xff] }
  0x85   : > { %1068 = vmatpush1.bf16.msra.mxu0 %v1067_v14  ;;  %942 = vmatprep.subr.bf16.mxu1 %v941_v15  ;;  %v1087_v14 = vpack.c.bf16 %v424_v8, %v422_v6  ;;  %v961_v15 = vpack.c.bf16 %v301_v10, %v299_v9  ;;  %v1093_v31 = vpack.c.bf16 %v433_v24, %v431_v23  ;;  %v309_v34 = vld [vmem:[#allocation3 + $0x2f8] sm:$0xff]  ;;  %v434_v42 = vld [vmem:[#allocation3 + $0x6e0] sm:$0xff]  ;;  %v436_v44 = vld [vmem:[#allocation3 + $0x6f0] sm:$0xff] }
  0x86   : > { %1070 = vmatprep.subr.bf16.mxu0 %v1069_v19  ;;  %v1089_v19 = vpack.c.bf16 %v429_v12, %v427_v11  ;;  %v437_v36 = vld [vmem:[#allocation3 + $0x6f8] sm:$0xff]  ;;  %v1095_v38 = vpack.c.bf16 %v432_v32, %v430_v30  ;;  %v1099_v48 = vpack.c.bf16 %v436_v44, %v434_v42  ;;  %v310_v50 = vld [vmem:[#allocation3 + $0x300] sm:$0xff]  ;;  %v312_v51 = vld [vmem:[#allocation3 + $0x310] sm:$0xff] }
  0x87   : > { %503 = vmatmul.mubr.f32.vlgmr.msra.gmra.mrb[0].mxu1 %v195_v25  ;;  %v963_v25 = vpack.c.bf16 %v300_v17, %v298_v16  ;;  %v1097_v43 = vpack.c.bf16 %v437_v36, %v435_v35  ;;  %v313_v46 = vld [vmem:[#allocation3 + $0x318] sm:$0xff]  ;;  %v314_v57 = vld [vmem:[#allocation3 + $0x320] sm:$0xff]  ;;  %v319_v59 = vld [vmem:[#allocation3 + $0x348] sm:$0xff] }
  0x88   : > { %944 = vmatpush1.bf16.msra.mxu1 %v943_v26  ;;  %645 = vmatmul.mubr.f32.vlgmr.msra.gmra.mrb[0].mxu0 %v865_v27  ;;  %v1091_v26 = vpack.c.bf16 %v428_v20, %v426_v18  ;;  %v965_v27 = vpack.c.bf16 %v305_v22, %v303_v21  ;;  %v321_v60 = vld [vmem:[#allocation3 + $0x358] sm:$0xff]  ;;  %v318_v63 = vld [vmem:[#allocation3 + $0x340] sm:$0xff]  ;;  %v324_v6 = vld [vmem:[#allocation3 + $0x370] sm:$0xff] }
  0x89   : > { %1072 = vmatpush1.bf16.msra.mxu0 %v1071_v28  ;;  %946 = vmatprep.subr.bf16.mxu1 %v945_v29  ;;  %v302_v28 = vld [vmem:[#allocation3 + $0x2c0] sm:$0xff]  ;;  %v304_v29 = vld [vmem:[#allocation3 + $0x2d0] sm:$0xff]  ;;  %v981_v62 = vpack.c.bf16 %v321_v60, %v319_v59  ;;  %v329_v8 = vld [vmem:[#allocation3 + $0x398] sm:$0xff] }
  0x8a   : > { %1074 = vmatprep.subr.bf16.mxu0 %v1073_v33  ;;  %715 = vmatprep.mubr.f32.mxu0 %v1325_v49  ;;  %v307_v33 = vld [vmem:[#allocation3 + $0x2e8] sm:$0xff]  ;;  %v967_v37 = vpack.c.bf16 %v304_v29, %v302_v28  ;;  %v322_v5 = vld [vmem:[#allocation3 + $0x360] sm:$0xff]  ;;  %v328_v12 = vld [vmem:[#allocation3 + $0x390] sm:$0xff] }
  0x8b   : > { %573 = vmatprep.mubr.f32.mxu1 %v863_v1  ;;  %v323_v1 = vld [vmem:[#allocation3 + $0x368] sm:$0xff]  ;;  %v987_v9 = vpack.c.bf16 %v324_v6, %v322_v5  ;;  %v326_v11 = vld [vmem:[#allocation3 + $0x380] sm:$0xff]  ;;  %v332_v18 = vld [vmem:[#allocation3 + $0x3b0] sm:$0xff] }
  0x8c   : > { %948 = vmatpush1.bf16.msra.mxu1 %v947_v39  ;;  %v969_v39 = vpack.c.bf16 %v309_v34, %v307_v33  ;;  %v330_v17 = vld [vmem:[#allocation3 + $0x3a0] sm:$0xff]  ;;  %v337_v20 = vld [vmem:[#allocation3 + $0x3d8] sm:$0xff]  ;;  %v336_v24 = vld [vmem:[#allocation3 + $0x3d0] sm:$0xff] }
  0x8d   : > { %1076 = vmatpush1.bf16.msra.mxu0 %v1075_v40  ;;  %950 = vmatprep.subr.bf16.mxu1 %v949_v41  ;;  %v306_v40 = vld [vmem:[#allocation3 + $0x2e0] sm:$0xff]  ;;  %v308_v41 = vld [vmem:[#allocation3 + $0x2f0] sm:$0xff]  ;;  %v995_v21 = vpack.c.bf16 %v332_v18, %v330_v17 }
  0x8e   : > { %1078 = vmatprep.subr.bf16.mxu0 %v1077_v45  ;;  %v311_v45 = vld [vmem:[#allocation3 + $0x308] sm:$0xff]  ;;  %v971_v47 = vpack.c.bf16 %v308_v41, %v306_v40  ;;  %v334_v23 = vld [vmem:[#allocation3 + $0x3c0] sm:$0xff]  ;;  %v340_v30 = vld [vmem:[#allocation3 + $0x3f0] sm:$0xff] }
  0x8f   : > { %v973_v49 = vpack.c.bf16 %v313_v46, %v311_v45  ;;  %v338_v29 = vld [vmem:[#allocation3 + $0x3e0] sm:$0xff] }
  0x90   : > { %952 = vmatpush1.bf16.msra.mxu1 %v951_v52  ;;  %v315_v52 = vld [vmem:[#allocation3 + $0x328] sm:$0xff] }
  0x91   : > { %1080 = vmatpush1.bf16.msra.mxu0 %v1079_v53  ;;  %954 = vmatprep.subr.bf16.mxu1 %v953_v54  ;;  %v317_v53 = vld [vmem:[#allocation3 + $0x338] sm:$0xff]  ;;  %v975_v54 = vpack.c.bf16 %v312_v51, %v310_v50 }
  0x92   : > { %1082 = vmatprep.subr.bf16.mxu0 %v1081_v58  ;;  %v977_v56 = vpack.c.bf16 %v317_v53, %v315_v52  ;;  %v316_v58 = vld [vmem:[#allocation3 + $0x330] sm:$0xff] }
  0x93   : > { %v979_v61 = vpack.c.bf16 %v316_v58, %v314_v57  ;;  %v861_v32 = vld [vmem:[%s1463_s21 + $0x2] ss:$4 sm:$0xff] }
  0x94   : > { %956 = vmatpush1.bf16.msra.mxu1 %v955_v0  ;;  %v320_v0 = vld [vmem:[#allocation3 + $0x350] sm:$0xff] }
  0x95   : > { %1084 = vmatpush1.bf16.msra.mxu0 %v1083_v2  ;;  %958 = vmatprep.subr.bf16.mxu1 %v957_v3  ;;  %v325_v2 = vld [vmem:[#allocation3 + $0x378] sm:$0xff]  ;;  %v983_v3 = vpack.c.bf16 %v320_v0, %v318_v63 }
  0x96   : > { %1086 = vmatprep.subr.bf16.mxu0 %v1085_v7  ;;  %v985_v4 = vpack.c.bf16 %v325_v2, %v323_v1  ;;  %v327_v7 = vld [vmem:[#allocation3 + $0x388] sm:$0xff] }
  0x97   : > { %v989_v10 = vpack.c.bf16 %v329_v8, %v327_v7 }
  0x98   : > { %960 = vmatpush1.bf16.msra.mxu1 %v959_v13  ;;  %v331_v13 = vld [vmem:[#allocation3 + $0x3a8] sm:$0xff] }
  0x99   : > { %1088 = vmatpush1.bf16.msra.mxu0 %v1087_v14  ;;  %962 = vmatprep.subr.bf16.mxu1 %v961_v15  ;;  %v333_v14 = vld [vmem:[#allocation3 + $0x3b8] sm:$0xff]  ;;  %v991_v15 = vpack.c.bf16 %v328_v12, %v326_v11 }
  0x9a   : > { %1090 = vmatprep.subr.bf16.mxu0 %v1089_v19  ;;  %v993_v16 = vpack.c.bf16 %v333_v14, %v331_v13  ;;  %v335_v19 = vld [vmem:[#allocation3 + $0x3c8] sm:$0xff] }
  0x9b   : > { %v997_v22 = vpack.c.bf16 %v337_v20, %v335_v19 }
  0x9c   : > { %964 = vmatpush1.bf16.msra.mxu1 %v963_v25  ;;  %v339_v25 = vld [vmem:[#allocation3 + $0x3e8] sm:$0xff] }
  0x9d   : > { %1092 = vmatpush1.bf16.msra.mxu0 %v1091_v26  ;;  %966 = vmatprep.subr.bf16.mxu1 %v965_v27  ;;  %v341_v26 = vld [vmem:[#allocation3 + $0x3f8] sm:$0xff]  ;;  %v999_v27 = vpack.c.bf16 %v336_v24, %v334_v23 }
  0x9e   : > { %1094 = vmatprep.subr.bf16.mxu0 %v1093_v31  ;;  %v1001_v28 = vpack.c.bf16 %v341_v26, %v339_v25  ;;  %v1003_v31 = vpack.c.bf16 %v340_v30, %v338_v29 }
  0xa0   : > { %968 = vmatpush1.bf16.msra.mxu1 %v967_v37 }
  0xa1   : > { %1096 = vmatpush1.bf16.msra.mxu0 %v1095_v38  ;;  %970 = vmatprep.subr.bf16.mxu1 %v969_v39 }
  0xa2   : > { %1098 = vmatprep.subr.bf16.mxu0 %v1097_v43 }
  0xa4   : > { %972 = vmatpush1.bf16.msra.mxu1 %v971_v47 }
  0xa5   : > { %1100 = vmatpush1.bf16.msra.mxu0 %v1099_v48  ;;  %974 = vmatprep.subr.bf16.mxu1 %v973_v49 }
  0xa8   : > { %716 = vmatmul.mubr.f32.vlgmr.msra.gmra.mrb[0].mxu0 %v869_v55  ;;  %976 = vmatpush1.bf16.msra.mxu1 %v975_v54 }
  0xa9   : > { %978 = vmatprep.subr.bf16.mxu1 %v977_v56 }
  0xac   : > { %980 = vmatpush1.bf16.msra.mxu1 %v979_v61 }
  0xad   : > { %982 = vmatprep.subr.bf16.mxu1 %v981_v62 }
  0xb0   : > { %984 = vmatpush1.bf16.msra.mxu1 %v983_v3 }
  0xb1   : > { %986 = vmatprep.subr.bf16.mxu1 %v985_v4 }
  0xb4   : > { %988 = vmatpush1.bf16.msra.mxu1 %v987_v9 }
  0xb5   : > { %990 = vmatprep.subr.bf16.mxu1 %v989_v10 }
  0xb8   : > { %992 = vmatpush1.bf16.msra.mxu1 %v991_v15 }
  0xb9   : > { %994 = vmatprep.subr.bf16.mxu1 %v993_v16 }
  0xbc   : > { %996 = vmatpush1.bf16.msra.mxu1 %v995_v21 }
  0xbd   : > { %998 = vmatprep.subr.bf16.mxu1 %v997_v22 }
  0xc0   : > { %1000 = vmatpush1.bf16.msra.mxu1 %v999_v27 }
  0xc1   : > { %1002 = vmatprep.subr.bf16.mxu1 %v1001_v28 }
  0xc4   : > { %1004 = vmatpush1.bf16.msra.mxu1 %v1003_v31 }
  0xc7   : > { %574 = vmatmul.mubr.f32.vlgmr.msra.gmra.mrb[0].mxu1 %v861_v32 }
 0x17b   : > { %v717_v33 = vpop.f32.mrb[0].mxu0 }
 0x17c   : > { %v719_v34 = vpop.f32.mrb[1].mxu0 }
 0x19a   : > { %v575_v35 = vpop.f32.mrb[0].mxu1 }
 0x19b   : > { %v1101_v36 = vadd.f32 %v717_v33, %v575_v35  ;;  %v577_v37 = vpop.f32.mrb[1].mxu1 }
 0x19c   : > { %v1102_v38 = vadd.f32 %v719_v34, %v577_v37 }
 0x19d   : > { %722 = vst [vmem:[%s1459_s18] sm:$0xff] %v1101_v36 }
 0x19e   : > { %723 = vst [vmem:[%s1459_s18 + $0x8] sm:$0xff] %v1102_v38 }
 0x19f   : > { %1234 = shalt.err (!%p1231_p9)
}
 0x1a0   : > { %s1235_s6 = scalar_lea.hbm %s1478_s8, 256  ;;  %s1239_s21 = scalar_lea.hbm %s1537_s2, 1024 }
 0x1a1   : > { %p1236_p11 = scmp.ne.s32.totalorder %s1478_s8, %s1235_s6  ;;  %p1240_p4 = scmp.lt.u32.totalorder %s1478_s8, %s1537_s2 }
 0x1a2   : > { %p1241_p3 = scmp.lt.u32.totalorder %s1239_s21, %s1235_s6  ;;  %p1243_p10 = scmp.lt.u32.totalorder %s1235_s6, %s1478_s8 }
 0x1a3   : > { %p1237_p13 = pnand %p1236_p11, %p1549_p12 }
 0x1a4   : > { %p1242_p8 = por %p1241_p3, %p1240_p4 }
 0x1a5   : > { %p1238_p1 = pneg %p1237_p13 }
 0x1a6   : > { %p1244_p0 = por %p1243_p10, %p1242_p8 }
 0x1a8   : > { %p1245_p2 = pnand %p1244_p0, %p1238_p1 }
 0x1aa   : > { %1248 = shalt.err (!%p1245_p2)
}
 0x1ab   : > { %1111 = dma.vmem_to_hbm [thread:$0]  (%p1549_p12), %s1480_s5, 256, %s1478_s8, %s725_s12  }
 0x1ac PF: > { %p1123_p5 = scmp.ge.s32.totalorder %s1319_s16, 2  ;;  %s753_s26 = sand.u32 1, %s1291_s9  }
 0x1ad   : > { %p1550_p6 = scmp.ne.s32.totalorder %s1543_s24, 0  ;;  %s754_s30 = scalar_lea.sflag [#allocation5], %s753_s26 }
 0x1af   : > { %p1118_p7 = pnand %p1123_p5, %p1550_p6 }
 0x1b1   : > { %1286 = dma.done.wait (!%p1118_p7), %s754_s30, 256  }
 0x1b2   : > { %1288 = vsyncadd (!%p1118_p7), %s754_s30, 4294967040  ;;  %s16_s16 = sadd.s32 1, %s1319_s16   ;;  %s1551_s9 = smov %s1295_s10 }
 0x1b3   : > { %p13_p9 = scmp.ge.s32.totalorder %s16_s16, 6   ;;  %s1552_s10 = smov %s1299_s11 }
 0x1b4   : > { %s1553_s11 = smov %s1421_s29  ;;  %s1554_s12 = smov %s1311_s14 }
 0x1b5   : > { %s1555_s13 = smov %s1315_s15  ;;  %s1556_s14 = smov %s1559_s19 }
 0x1b6   : > { %s1557_s15 = smov %s1563_s20  ;;  %15 = sbr.rel (!%p13_p9) target bundleno = 6 (0x6), region = 79 }
 0x1bd   :  { %759 = vsyncpa [#allocation4], 1 }
 0x1be   :  { %761 = vsyncpa [#allocation4 + $0x1], 1 }
 0x1bf   :  { %762 = vsyncpa [#allocation5], 1 }
 0x1c0   :  { %764 = vsyncpa [#allocation5 + $0x1], 1 }

</bundles_post_ra>
